<compile_context>
chip_gen: v5e
topology: v5e:2x2
jax: 0.10.0
libtpu: 0.0.40
codegen_flags: <defaults>
</compile_context>

<pallas_src>
import functools
import math

import jax
import jax.numpy as jnp
import numpy as np
from jax.experimental import pallas as pl
from jax.experimental.pallas import tpu as pltpu


def _cross_attn_kernel(q_ref, m_ref, bias_ref, qgw_ref, qgb_ref, kvw_ref, o_ref,
                       q_scr, gate_scr, logits_scr, m_scr, l_scr, acc_scr,
                       *, num_head, key_dim, value_dim, bblk, q_len, k_blk):
    H, kd, vd = num_head, key_dim, value_dim
    a_dim = q_ref.shape[-1]
    m_dim = m_ref.shape[-1]
    k_step = pl.program_id(1)

    # --- once per batch block (first K tile): fused q||gate projection + state init.
    # 1/sqrt(kd) and query_b are already folded into qgw/qgb by the wrapper.
    @pl.when(k_step == 0)
    def _init():
        q2 = q_ref[...].reshape(bblk * q_len, a_dim)
        qg = jnp.dot(q2, qgw_ref[...], preferred_element_type=jnp.float32) + qgb_ref[...]
        q_scr[...] = qg[:, :H * kd].reshape(bblk, q_len, H * kd)
        gate_scr[...] = jax.nn.sigmoid(qg[:, H * kd:]).reshape(bblk, q_len, H * vd)
        m_scr[...] = jnp.full_like(m_scr, -jnp.inf)
        l_scr[...] = jnp.zeros_like(l_scr)
        acc_scr[...] = jnp.zeros_like(acc_scr)

    # --- every K tile: fused k||v projection of this key/value tile.
    m2 = m_ref[...].reshape(bblk * k_blk, m_dim)
    kv = jnp.dot(m2, kvw_ref[...], preferred_element_type=jnp.float32)
    k3 = kv[:, :H * kd].reshape(bblk, k_blk, H * kd)
    v3 = kv[:, H * kd:].reshape(bblk, k_blk, H * vd)

    # --- per-head QK^T (batched over the batch block), written straight into the
    # stacked (bblk, H*Q, k_blk) scratch slab: no concatenate, no doubled footprint.
    # TODO(synk): fold (bblk, H) into one dot_general batch dim (fewer, larger MXU ops)
    # once Mosaic's multi-batch-dim dot lowering is verified for this layout.
    q3 = q_scr[...]
    for h in range(H):
        logits_scr[:, pl.ds(h * q_len, q_len), :] = jnp.einsum(
            'bqc,bkc->bqk',
            q3[:, :, h * kd:(h + 1) * kd],
            k3[:, :, h * kd:(h + 1) * kd],
            preferred_element_type=jnp.float32)

    # --- stacked bias add (one op) + online-softmax update (one max/exp/sum chain).
    logits = logits_scr[...] + bias_ref[...].astype(jnp.float32)
    m_prev = m_scr[...]
    m_new = jnp.maximum(m_prev, jnp.max(logits, axis=-1, keepdims=True))
    alpha = jnp.exp(m_prev - m_new)                      # rescale factor for old state
    p = jnp.exp(logits - m_new)
    l_scr[...] = alpha * l_scr[...] + jnp.sum(p, axis=-1, keepdims=True)
    m_scr[...] = m_new

    # --- per-head PV with the flash-style rescale folded into the accumulate.
    for h in range(H):
        sl = pl.ds(h * q_len, q_len)
        acc_scr[:, sl, :] = (
            alpha[:, h * q_len:(h + 1) * q_len, :] * acc_scr[:, sl, :]
            + jnp.einsum('bqk,bkc->bqc',
                         p[:, h * q_len:(h + 1) * q_len, :],
                         v3[:, :, h * vd:(h + 1) * vd],
                         preferred_element_type=jnp.float32))

    # --- last K tile: normalize, gate, store. Heads move from sublane-stacked rows
    # (H*Q) to lane-stacked cols (H*vd) via per-head slice writes (no lax.transpose).
    @pl.when(k_step == pl.num_programs(1) - 1)
    def _finalize():
        inv_l = pl.reciprocal(l_scr[...], approx=True)   # EUP slot, essentially free
        gate = gate_scr[...]
        for h in range(H):
            o_ref[:, :, pl.ds(h * vd, vd)] = (
                acc_scr[:, pl.ds(h * q_len, q_len), :]
                * inv_l[:, h * q_len:(h + 1) * q_len, :]
                * gate[:, :, h * vd:(h + 1) * vd]
            ).astype(o_ref.dtype)


def _vmem_capacity_bytes():
    try:
        info = pltpu.get_tpu_info()
        return int(getattr(info, "vmem_capacity_bytes", 64 * 1024 * 1024))
    except Exception:
        return 64 * 1024 * 1024          # conservative (v7x-sized) fallback


def _pick_block_k(K, max_block=512):
    """Full K if small; otherwise the largest multiple-of-128 divisor (BlockSpec rule:
    minor dim of the bias block must be a multiple of 128 or equal the full K)."""
    if K <= max_block:
        return K
    cand = (max_block // 128) * 128
    while cand >= 128:
        if K % cand == 0:
            return cand
        cand -= 128
    return K                              # no admissible tile; fall back to untiled K


def _pick_block_b(B, Q, block_k, H, kd, vd, a_dim, m_dim, in_itemsize, budget_bytes):
    """Budget-derived batch block: VMEM footprint scales linearly with block_b."""
    f32 = 4
    per_b = (2 * H * Q * block_k * f32            # bias block (double-buffered)
             + 2 * block_k * m_dim * in_itemsize  # m_data block (double-buffered)
             + 2 * Q * a_dim * in_itemsize        # q_data block (resident)
             + 2 * Q * H * vd * f32               # output block
             + Q * H * (kd + vd) * f32            # q_scr + gate_scr
             + H * Q * block_k * f32              # logits slab scratch
             + H * Q * (vd + 2) * f32             # acc / m / l scratch
             + 3 * H * Q * block_k * f32)         # live logits / p intermediates
    fixed = 2 * (a_dim + m_dim + 1) * H * (kd + vd) * max(in_itemsize, f32)  # weights
    avail = max(budget_bytes - fixed, per_b)
    bb = int(max(1, min(B, avail // per_b)))
    if B >= 2:
        bb = min(bb, max(1, B // 2))      # >=2 batch grid steps: v7x megacore + overlap
    while B % bb:
        bb -= 1
    return bb


def batched_cross_attention_xsmm(q_data, m_data, batched_bias,
                                 query_w, query_b, key_w, value_w, gating_w,
                                 *, block_b=None, block_k=None, bias_in_bf16=False):
    """Pallas implementation of BatchedCrossAttentionXSMM.forward."""
    B, Q, a_dim = q_data.shape
    _, K, m_dim = m_data.shape
    num_head, key_dim = query_w.shape[1], query_w.shape[2]
    value_dim = value_w.shape[2]
    H = num_head

    # TODO(synk): pad Q/K to multiples of 8 instead of asserting (non-aligned shapes
    # would otherwise trigger hidden relayout copies inside the kernel reshapes).
    assert Q % 8 == 0 and K % 8 == 0, "Q and K must be multiples of 8 (sublane tile)"

    vmem_cap = _vmem_capacity_bytes()
    vmem_limit = int(min(vmem_cap * 3 // 4, 100 * 1024 * 1024))
    block_budget = int(vmem_cap * 0.45)

    if block_k is None:
        block_k = _pick_block_k(K)
    assert K % block_k == 0 and (block_k == K or block_k % 128 == 0)
    in_itemsize = jnp.dtype(q_data.dtype).itemsize
    if block_b is None:
        block_b = _pick_block_b(B, Q, block_k, H, key_dim, value_dim,
                                a_dim, m_dim, in_itemsize, block_budget)
    assert B % block_b == 0

    # Wrapper-side layout plumbing (free): fold 1/sqrt(kd) into the query projection,
    # fuse q||gate and k||v weights, flatten the bias heads onto the sublane axis so
    # the kernel adds it to the stacked logits slab in one op.
    scale = 1.0 / math.sqrt(key_dim)
    qgw = jnp.concatenate([(query_w * scale).reshape(a_dim, H * key_dim),
                           gating_w.reshape(a_dim, H * value_dim)],
                          axis=1).astype(q_data.dtype)
    kvw = jnp.concatenate([key_w.reshape(m_dim, H * key_dim),
                           value_w.reshape(m_dim, H * value_dim)],
                          axis=1).astype(m_data.dtype)
    qgb = jnp.concatenate([(query_b * scale).reshape(1, H * key_dim),
                           jnp.zeros((1, H * value_dim), query_b.dtype)],
                          axis=1).astype(jnp.float32)
    bias2 = batched_bias.reshape(B, H * Q, K)
    if bias_in_bf16:  # optional: halves the dominant HBM stream (v5e/v6e roofline)
        bias2 = bias2.astype(jnp.bfloat16)

    kernel = functools.partial(_cross_attn_kernel,
                               num_head=H, key_dim=key_dim, value_dim=value_dim,
                               bblk=block_b, q_len=Q, k_blk=block_k)

    nb, nk = B // block_b, K // block_k
    f32b = 4
    flops = int(2 * B * Q * a_dim * H * (key_dim + value_dim)
                + 2 * B * K * m_dim * H * (key_dim + value_dim)
                + 2 * B * H * Q * K * (key_dim + value_dim))
    transcendentals = int(B * H * Q * K + B * Q * H * value_dim)
    bytes_accessed = int(q_data.size * in_itemsize + m_data.size * in_itemsize
                         + bias2.size * jnp.dtype(bias2.dtype).itemsize
                         + (qgw.size + kvw.size) * in_itemsize + qgb.size * f32b
                         + B * Q * H * value_dim * f32b)

    # TODO(synk): the three constant-index weight inputs could use
    # pipeline_mode=pl.Buffered(1) (or a one-shot DMA into persistent scratch) to
    # drop their pointless second pipeline buffer on VMEM-tight v7x.
    # TODO(synk): for production configs consider a lane-dense output slab
    # (last dim a multiple of 128) if the in-kernel relayout cost is justified.
    out = pl.pallas_call(
        kernel,
        out_shape=jax.ShapeDtypeStruct((B, Q, H * value_dim), jnp.float32),
        grid=(nb, nk),
        in_specs=[
            pl.BlockSpec((block_b, Q, a_dim), lambda b, k: (b, 0, 0)),
            pl.BlockSpec((block_b, block_k, m_dim), lambda b, k: (b, k, 0)),
            pl.BlockSpec((block_b, H * Q, block_k), lambda b, k: (b, 0, k)),
            pl.BlockSpec((a_dim, H * (key_dim + value_dim)), lambda b, k: (0, 0)),
            pl.BlockSpec((1, H * (key_dim + value_dim)), lambda b, k: (0, 0)),
            pl.BlockSpec((m_dim, H * (key_dim + value_dim)), lambda b, k: (0, 0)),
        ],
        out_specs=pl.BlockSpec((block_b, Q, H * value_dim), lambda b, k: (b, 0, 0)),
        scratch_shapes=[
            pltpu.VMEM((block_b, Q, H * key_dim), jnp.float32),     # scaled q
            pltpu.VMEM((block_b, Q, H * value_dim), jnp.float32),   # sigmoid gate
            pltpu.VMEM((block_b, H * Q, block_k), jnp.float32),     # stacked logits slab
            pltpu.VMEM((block_b, H * Q, 1), jnp.float32),           # running max
            pltpu.VMEM((block_b, H * Q, 1), jnp.float32),           # running sum
            pltpu.VMEM((block_b, H * Q, value_dim), jnp.float32),   # running weighted V
        ],
        compiler_params=pltpu.CompilerParams(
            dimension_semantics=("parallel", "arbitrary"),
            vmem_limit_bytes=vmem_limit),
        cost_estimate=pl.CostEstimate(flops=flops,
                                      transcendentals=transcendentals,
                                      bytes_accessed=bytes_accessed),
    )(q_data, m_data, bias2, qgw, qgb, kvw)

    return out.reshape(B, Q, H, value_dim)


def _reference(q_data, m_data, batched_bias, query_w, query_b, key_w, value_w, gating_w):
    key_dim = query_w.shape[-1]
    q = jnp.einsum('bqa,ahc->bqhc', q_data, query_w) + query_b[None]
    k = jnp.einsum('bka,ahc->bkhc', m_data, key_w)
    v = jnp.einsum('bka,ahc->bkhc', m_data, value_w)
    logits = jnp.einsum('bqhc,bkhc->bhqk', q, k) / math.sqrt(key_dim) + batched_bias
    w = jax.nn.softmax(logits, axis=-1)
    wv = jnp.einsum('bhqk,bkhc->bqhc', w, v)
    gate = jax.nn.sigmoid(jnp.einsum('bqa,ahc->bqhc', q_data, gating_w))
    return wv * gate


if __name__ == "__main__":
    # Module config: BatchedCrossAttentionXSMM(num_head=4, a_dim=32, m_dim=32, output_dim=32)
    num_head = 4
    a_dim = 32
    m_dim = 32
    key_dim = a_dim // num_head      # 8
    value_dim = m_dim // num_head    # 8

    B, Q, K = 2, 8, 8

    root = jax.random.PRNGKey(0)
    ks = jax.random.split(root, 8)

    # Deterministic synthetic parameters (module params are not trained / requires_grad=False).
    query_w = 0.1 * jax.random.normal(ks[0], (a_dim, num_head, key_dim), jnp.float32)
    query_b = 0.1 * jax.random.normal(ks[1], (1, num_head, key_dim), jnp.float32)
    key_w = 0.1 * jax.random.normal(ks[2], (m_dim, num_head, key_dim), jnp.float32)
    value_w = 0.1 * jax.random.normal(ks[3], (m_dim, num_head, value_dim), jnp.float32)
    gating_w = 0.1 * jax.random.normal(ks[4], (a_dim, num_head, value_dim), jnp.float32)

    q_data = jax.random.normal(ks[5], (B, Q, a_dim), jnp.float32)
    m_data = jax.random.normal(ks[6], (B, K, m_dim), jnp.float32)
    batched_bias = 0.5 * jax.random.normal(ks[7], (B, num_head, Q, K), jnp.float32)

    out = batched_cross_attention_xsmm(q_data, m_data, batched_bias,
                                       query_w, query_b, key_w, value_w, gating_w)
    out = jax.block_until_ready(out)

    ref = _reference(q_data, m_data, batched_bias,
                     query_w, query_b, key_w, value_w, gating_w)
    # Tolerance loosened slightly for pl.reciprocal(approx=True) in the softmax denom.
    np.testing.assert_allclose(np.asarray(out), np.asarray(ref), rtol=3e-3, atol=3e-3)
    assert out.shape == (B, Q, num_head, value_dim) and out.dtype == jnp.float32

    print("KERNEL_OK")
</pallas_src>

<mosaic_0001>
module attributes {stable_mosaic.version = 11 : i64} {
  func.func @_cross_attn_kernel(%arg0: i32, %arg1: i32, %arg2: memref<1x8x32xf32, #tpu.memory_space<vmem>>, %arg3: memref<1x8x32xf32, #tpu.memory_space<vmem>>, %arg4: memref<1x32x8xf32, #tpu.memory_space<vmem>>, %arg5: memref<32x64xf32, #tpu.memory_space<vmem>>, %arg6: memref<1x64xf32, #tpu.memory_space<vmem>>, %arg7: memref<32x64xf32, #tpu.memory_space<vmem>>, %arg8: memref<1x8x32xf32, #tpu.memory_space<vmem>>, %arg9: memref<1x8x32xf32, #tpu.memory_space<vmem>>, %arg10: memref<1x8x32xf32, #tpu.memory_space<vmem>>, %arg11: memref<1x32x8xf32, #tpu.memory_space<vmem>>, %arg12: memref<1x32x1xf32, #tpu.memory_space<vmem>>, %arg13: memref<1x32x1xf32, #tpu.memory_space<vmem>>, %arg14: memref<1x32x8xf32, #tpu.memory_space<vmem>>) attributes {dimension_semantics = [#tpu.dimension_semantics<parallel>, #tpu.dimension_semantics<arbitrary>], iteration_bounds = array<i64: 2, 1>, scalar_prefetch = 0 : i64, scratch_operands = 6 : i64, tpu.core_type = #tpu.core_type<tc>, window_params = [{transform_indices = @transform_0, window_bounds = array<i64: 1, 8, 32>}, {transform_indices = @transform_1, window_bounds = array<i64: 1, 8, 32>}, {transform_indices = @transform_2, window_bounds = array<i64: 1, 32, 8>}, {pipeline_mode = #tpu.pipeline_mode<synchronous>, transform_indices = @transform_3, window_bounds = array<i64: 32, 64>}, {pipeline_mode = #tpu.pipeline_mode<synchronous>, transform_indices = @transform_4, window_bounds = array<i64: 1, 64>}, {pipeline_mode = #tpu.pipeline_mode<synchronous>, transform_indices = @transform_5, window_bounds = array<i64: 32, 64>}, {transform_indices = @transform_6, window_bounds = array<i64: 1, 8, 32>}]} {
    %c0_i32 = arith.constant 0 : i32
    %0 = arith.cmpi eq, %arg1, %c0_i32 : i32
    %1 = arith.extui %0 : i1 to i32
    %c0_i32_0 = arith.constant 0 : i32
    %2 = arith.cmpi ne, %1, %c0_i32_0 : i32
    scf.if %2 {
      %c0_71 = arith.constant 0 : index
      %c0_72 = arith.constant 0 : index
      %c0_73 = arith.constant 0 : index
      %86 = vector.load %arg2[%c0_71, %c0_72, %c0_73] : memref<1x8x32xf32, #tpu.memory_space<vmem>>, vector<1x8x32xf32>
      %87 = vector.shape_cast %86 : vector<1x8x32xf32> to vector<8x32xf32>
      %c0_74 = arith.constant 0 : index
      %c0_75 = arith.constant 0 : index
      %88 = vector.load %arg5[%c0_74, %c0_75] : memref<32x64xf32, #tpu.memory_space<vmem>>, vector<32x64xf32>
      %cst_76 = arith.constant dense<0.000000e+00> : vector<8x64xf32>
      %89 = tpu.matmul %87, %88, %cst_76 {dimension_numbers = #tpu.dot_dimension_numbers<[1], [0], [0], [1], [0, 0, 1, 1], [], []>} : vector<8x32xf32>, vector<32x64xf32>, vector<8x64xf32> -> vector<8x64xf32>
      %c0_77 = arith.constant 0 : index
      %c0_78 = arith.constant 0 : index
      %90 = vector.load %arg6[%c0_77, %c0_78] : memref<1x64xf32, #tpu.memory_space<vmem>>, vector<1x64xf32>
      %91 = vector.broadcast %90 : vector<1x64xf32> to vector<8x64xf32>
      %92 = arith.addf %89, %91 : vector<8x64xf32>
      %93 = vector.extract_strided_slice %92 {offsets = [0, 0], sizes = [8, 32], strides = [1, 1]} : vector<8x64xf32> to vector<8x32xf32>
      %94 = vector.shape_cast %93 : vector<8x32xf32> to vector<1x8x32xf32>
      %c0_79 = arith.constant 0 : index
      %c0_80 = arith.constant 0 : index
      %c0_81 = arith.constant 0 : index
      %95 = vector.load %arg9[%c0_79, %c0_80, %c0_81] : memref<1x8x32xf32, #tpu.memory_space<vmem>>, vector<1x8x32xf32>
      tpu.vector_store %arg9[%c0_79, %c0_80, %c0_81], %94 {strides = array<i32>} : memref<1x8x32xf32, #tpu.memory_space<vmem>>, vector<1x8x32xf32>,
      %96 = vector.extract_strided_slice %92 {offsets = [0, 32], sizes = [8, 32], strides = [1, 1]} : vector<8x64xf32> to vector<8x32xf32>
      %97 = arith.negf %96 : vector<8x32xf32>
      %98 = math.exp %97 : vector<8x32xf32>
      %cst_82 = arith.constant 1.000000e+00 : f32
      %99 = vector.broadcast %cst_82 : f32 to vector<8x32xf32>
      %100 = arith.addf %99, %98 : vector<8x32xf32>
      %101 = arith.divf %99, %100 : vector<8x32xf32>
      %102 = vector.shape_cast %101 : vector<8x32xf32> to vector<1x8x32xf32>
      %c0_83 = arith.constant 0 : index
      %c0_84 = arith.constant 0 : index
      %c0_85 = arith.constant 0 : index
      %103 = vector.load %arg10[%c0_83, %c0_84, %c0_85] : memref<1x8x32xf32, #tpu.memory_space<vmem>>, vector<1x8x32xf32>
      tpu.vector_store %arg10[%c0_83, %c0_84, %c0_85], %102 {strides = array<i32>} : memref<1x8x32xf32, #tpu.memory_space<vmem>>, vector<1x8x32xf32>,
      %cst_86 = arith.constant 0xFF800000 : f32
      %104 = vector.broadcast %cst_86 : f32 to vector<1x32x1xf32>
      %c0_87 = arith.constant 0 : index
      %c0_88 = arith.constant 0 : index
      %c0_89 = arith.constant 0 : index
      %105 = vector.load %arg12[%c0_87, %c0_88, %c0_89] : memref<1x32x1xf32, #tpu.memory_space<vmem>>, vector<1x32x1xf32>
      tpu.vector_store %arg12[%c0_87, %c0_88, %c0_89], %104 {strides = array<i32>} : memref<1x32x1xf32, #tpu.memory_space<vmem>>, vector<1x32x1xf32>,
      %cst_90 = arith.constant 0.000000e+00 : f32
      %106 = vector.broadcast %cst_90 : f32 to vector<1x32x1xf32>
      %c0_91 = arith.constant 0 : index
      %c0_92 = arith.constant 0 : index
      %c0_93 = arith.constant 0 : index
      %107 = vector.load %arg13[%c0_91, %c0_92, %c0_93] : memref<1x32x1xf32, #tpu.memory_space<vmem>>, vector<1x32x1xf32>
      tpu.vector_store %arg13[%c0_91, %c0_92, %c0_93], %106 {strides = array<i32>} : memref<1x32x1xf32, #tpu.memory_space<vmem>>, vector<1x32x1xf32>,
      %cst_94 = arith.constant 0.000000e+00 : f32
      %108 = vector.broadcast %cst_94 : f32 to vector<1x32x8xf32>
      %c0_95 = arith.constant 0 : index
      %c0_96 = arith.constant 0 : index
      %c0_97 = arith.constant 0 : index
      %109 = vector.load %arg14[%c0_95, %c0_96, %c0_97] : memref<1x32x8xf32, #tpu.memory_space<vmem>>, vector<1x32x8xf32>
      tpu.vector_store %arg14[%c0_95, %c0_96, %c0_97], %108 {strides = array<i32>} : memref<1x32x8xf32, #tpu.memory_space<vmem>>, vector<1x32x8xf32>,
    } else {
    }
    %c0 = arith.constant 0 : index
    %c0_1 = arith.constant 0 : index
    %c0_2 = arith.constant 0 : index
    %3 = vector.load %arg3[%c0, %c0_1, %c0_2] : memref<1x8x32xf32, #tpu.memory_space<vmem>>, vector<1x8x32xf32>
    %4 = vector.shape_cast %3 : vector<1x8x32xf32> to vector<8x32xf32>
    %c0_3 = arith.constant 0 : index
    %c0_4 = arith.constant 0 : index
    %5 = vector.load %arg7[%c0_3, %c0_4] : memref<32x64xf32, #tpu.memory_space<vmem>>, vector<32x64xf32>
    %cst = arith.constant dense<0.000000e+00> : vector<8x64xf32>
    %6 = tpu.matmul %4, %5, %cst {dimension_numbers = #tpu.dot_dimension_numbers<[1], [0], [0], [1], [0, 0, 1, 1], [], []>} : vector<8x32xf32>, vector<32x64xf32>, vector<8x64xf32> -> vector<8x64xf32>
    %7 = vector.extract_strided_slice %6 {offsets = [0, 0], sizes = [8, 32], strides = [1, 1]} : vector<8x64xf32> to vector<8x32xf32>
    %8 = vector.shape_cast %7 : vector<8x32xf32> to vector<1x8x32xf32>
    %9 = vector.extract_strided_slice %6 {offsets = [0, 32], sizes = [8, 32], strides = [1, 1]} : vector<8x64xf32> to vector<8x32xf32>
    %10 = vector.shape_cast %9 : vector<8x32xf32> to vector<1x8x32xf32>
    %c0_5 = arith.constant 0 : index
    %c0_6 = arith.constant 0 : index
    %c0_7 = arith.constant 0 : index
    %11 = vector.load %arg9[%c0_5, %c0_6, %c0_7] : memref<1x8x32xf32, #tpu.memory_space<vmem>>, vector<1x8x32xf32>
    %12 = vector.extract_strided_slice %11 {offsets = [0, 0, 0], sizes = [1, 8, 8], strides = [1, 1, 1]} : vector<1x8x32xf32> to vector<1x8x8xf32>
    %13 = vector.extract_strided_slice %8 {offsets = [0, 0, 0], sizes = [1, 8, 8], strides = [1, 1, 1]} : vector<1x8x32xf32> to vector<1x8x8xf32>
    "tpu.trace_start"() <{level = 10 : i32, message = "bqc,bkc->bqk"}> : () -> ()
    %cst_8 = arith.constant dense<0.000000e+00> : vector<1x8x8xf32>
    %14 = tpu.matmul %12, %13, %cst_8 {dimension_numbers = #tpu.dot_dimension_numbers<[2], [2], [1], [1], [0, 0, 0, 1, 1, 1], [0], [0]>} : vector<1x8x8xf32>, vector<1x8x8xf32>, vector<1x8x8xf32> -> vector<1x8x8xf32>
    "tpu.trace_stop"() : () -> ()
    %c0_9 = arith.constant 0 : index
    %c0_10 = arith.constant 0 : index
    %c0_11 = arith.constant 0 : index
    %15 = vector.load %arg11[%c0_9, %c0_10, %c0_11] : memref<1x32x8xf32, #tpu.memory_space<vmem>>, vector<1x8x8xf32>
    tpu.vector_store %arg11[%c0_9, %c0_10, %c0_11], %14 {strides = array<i32>} : memref<1x32x8xf32, #tpu.memory_space<vmem>>, vector<1x8x8xf32>,
    %16 = vector.extract_strided_slice %11 {offsets = [0, 0, 8], sizes = [1, 8, 8], strides = [1, 1, 1]} : vector<1x8x32xf32> to vector<1x8x8xf32>
    %17 = vector.extract_strided_slice %8 {offsets = [0, 0, 8], sizes = [1, 8, 8], strides = [1, 1, 1]} : vector<1x8x32xf32> to vector<1x8x8xf32>
    "tpu.trace_start"() <{level = 10 : i32, message = "bqc,bkc->bqk"}> : () -> ()
    %cst_12 = arith.constant dense<0.000000e+00> : vector<1x8x8xf32>
    %18 = tpu.matmul %16, %17, %cst_12 {dimension_numbers = #tpu.dot_dimension_numbers<[2], [2], [1], [1], [0, 0, 0, 1, 1, 1], [0], [0]>} : vector<1x8x8xf32>, vector<1x8x8xf32>, vector<1x8x8xf32> -> vector<1x8x8xf32>
    "tpu.trace_stop"() : () -> ()
    %c0_13 = arith.constant 0 : index
    %c8 = arith.constant 8 : index
    %c0_14 = arith.constant 0 : index
    %19 = vector.load %arg11[%c0_13, %c8, %c0_14] : memref<1x32x8xf32, #tpu.memory_space<vmem>>, vector<1x8x8xf32>
    tpu.vector_store %arg11[%c0_13, %c8, %c0_14], %18 {strides = array<i32>} : memref<1x32x8xf32, #tpu.memory_space<vmem>>, vector<1x8x8xf32>,
    %20 = vector.extract_strided_slice %11 {offsets = [0, 0, 16], sizes = [1, 8, 8], strides = [1, 1, 1]} : vector<1x8x32xf32> to vector<1x8x8xf32>
    %21 = vector.extract_strided_slice %8 {offsets = [0, 0, 16], sizes = [1, 8, 8], strides = [1, 1, 1]} : vector<1x8x32xf32> to vector<1x8x8xf32>
    "tpu.trace_start"() <{level = 10 : i32, message = "bqc,bkc->bqk"}> : () -> ()
    %cst_15 = arith.constant dense<0.000000e+00> : vector<1x8x8xf32>
    %22 = tpu.matmul %20, %21, %cst_15 {dimension_numbers = #tpu.dot_dimension_numbers<[2], [2], [1], [1], [0, 0, 0, 1, 1, 1], [0], [0]>} : vector<1x8x8xf32>, vector<1x8x8xf32>, vector<1x8x8xf32> -> vector<1x8x8xf32>
    "tpu.trace_stop"() : () -> ()
    %c0_16 = arith.constant 0 : index
    %c16 = arith.constant 16 : index
    %c0_17 = arith.constant 0 : index
    %23 = vector.load %arg11[%c0_16, %c16, %c0_17] : memref<1x32x8xf32, #tpu.memory_space<vmem>>, vector<1x8x8xf32>
    tpu.vector_store %arg11[%c0_16, %c16, %c0_17], %22 {strides = array<i32>} : memref<1x32x8xf32, #tpu.memory_space<vmem>>, vector<1x8x8xf32>,
    %24 = vector.extract_strided_slice %11 {offsets = [0, 0, 24], sizes = [1, 8, 8], strides = [1, 1, 1]} : vector<1x8x32xf32> to vector<1x8x8xf32>
    %25 = vector.extract_strided_slice %8 {offsets = [0, 0, 24], sizes = [1, 8, 8], strides = [1, 1, 1]} : vector<1x8x32xf32> to vector<1x8x8xf32>
    "tpu.trace_start"() <{level = 10 : i32, message = "bqc,bkc->bqk"}> : () -> ()
    %cst_18 = arith.constant dense<0.000000e+00> : vector<1x8x8xf32>
    %26 = tpu.matmul %24, %25, %cst_18 {dimension_numbers = #tpu.dot_dimension_numbers<[2], [2], [1], [1], [0, 0, 0, 1, 1, 1], [0], [0]>} : vector<1x8x8xf32>, vector<1x8x8xf32>, vector<1x8x8xf32> -> vector<1x8x8xf32>
    "tpu.trace_stop"() : () -> ()
    %c0_19 = arith.constant 0 : index
    %c24 = arith.constant 24 : index
    %c0_20 = arith.constant 0 : index
    %27 = vector.load %arg11[%c0_19, %c24, %c0_20] : memref<1x32x8xf32, #tpu.memory_space<vmem>>, vector<1x8x8xf32>
    tpu.vector_store %arg11[%c0_19, %c24, %c0_20], %26 {strides = array<i32>} : memref<1x32x8xf32, #tpu.memory_space<vmem>>, vector<1x8x8xf32>,
    %c0_21 = arith.constant 0 : index
    %c0_22 = arith.constant 0 : index
    %c0_23 = arith.constant 0 : index
    %28 = vector.load %arg11[%c0_21, %c0_22, %c0_23] : memref<1x32x8xf32, #tpu.memory_space<vmem>>, vector<1x32x8xf32>
    %c0_24 = arith.constant 0 : index
    %c0_25 = arith.constant 0 : index
    %c0_26 = arith.constant 0 : index
    %29 = vector.load %arg4[%c0_24, %c0_25, %c0_26] : memref<1x32x8xf32, #tpu.memory_space<vmem>>, vector<1x32x8xf32>
    %30 = arith.addf %28, %29 : vector<1x32x8xf32>
    %c0_27 = arith.constant 0 : index
    %c0_28 = arith.constant 0 : index
    %c0_29 = arith.constant 0 : index
    %31 = vector.load %arg12[%c0_27, %c0_28, %c0_29] : memref<1x32x1xf32, #tpu.memory_space<vmem>>, vector<1x32x1xf32>
    %cst_30 = arith.constant dense<0xFF800000> : vector<1x32xf32>
    %32 = vector.multi_reduction <maximumf>, %30, %cst_30 [2] : vector<1x32x8xf32> to vector<1x32xf32>
    %33 = vector.shape_cast %32 : vector<1x32xf32> to vector<1x32x1xf32>
    %34 = arith.maximumf %31, %33 : vector<1x32x1xf32>
    %35 = arith.subf %31, %34 : vector<1x32x1xf32>
    %36 = math.exp %35 : vector<1x32x1xf32>
    %37 = vector.broadcast %34 : vector<1x32x1xf32> to vector<1x32x8xf32>
    %38 = arith.subf %30, %37 : vector<1x32x8xf32>
    %39 = math.exp %38 : vector<1x32x8xf32>
    %c0_31 = arith.constant 0 : index
    %c0_32 = arith.constant 0 : index
    %c0_33 = arith.constant 0 : index
    %40 = vector.load %arg13[%c0_31, %c0_32, %c0_33] : memref<1x32x1xf32, #tpu.memory_space<vmem>>, vector<1x32x1xf32>
    %41 = arith.mulf %36, %40 : vector<1x32x1xf32>
    %cst_34 = arith.constant dense<0.000000e+00> : vector<1x32xf32>
    %42 = vector.multi_reduction <add>, %39, %cst_34 [2] : vector<1x32x8xf32> to vector<1x32xf32>
    %43 = vector.shape_cast %42 : vector<1x32xf32> to vector<1x32x1xf32>
    %44 = arith.addf %41, %43 : vector<1x32x1xf32>
    %c0_35 = arith.constant 0 : index
    %c0_36 = arith.constant 0 : index
    %c0_37 = arith.constant 0 : index
    %45 = vector.load %arg13[%c0_35, %c0_36, %c0_37] : memref<1x32x1xf32, #tpu.memory_space<vmem>>, vector<1x32x1xf32>
    tpu.vector_store %arg13[%c0_35, %c0_36, %c0_37], %44 {strides = array<i32>} : memref<1x32x1xf32, #tpu.memory_space<vmem>>, vector<1x32x1xf32>,
    %c0_38 = arith.constant 0 : index
    %c0_39 = arith.constant 0 : index
    %c0_40 = arith.constant 0 : index
    %46 = vector.load %arg12[%c0_38, %c0_39, %c0_40] : memref<1x32x1xf32, #tpu.memory_space<vmem>>, vector<1x32x1xf32>
    tpu.vector_store %arg12[%c0_38, %c0_39, %c0_40], %34 {strides = array<i32>} : memref<1x32x1xf32, #tpu.memory_space<vmem>>, vector<1x32x1xf32>,
    %47 = vector.extract_strided_slice %36 {offsets = [0, 0, 0], sizes = [1, 8, 1], strides = [1, 1, 1]} : vector<1x32x1xf32> to vector<1x8x1xf32>
    %c0_41 = arith.constant 0 : index
    %c0_42 = arith.constant 0 : index
    %c0_43 = arith.constant 0 : index
    %48 = vector.load %arg14[%c0_41, %c0_42, %c0_43] : memref<1x32x8xf32, #tpu.memory_space<vmem>>, vector<1x8x8xf32>
    %49 = vector.broadcast %47 : vector<1x8x1xf32> to vector<1x8x8xf32>
    %50 = arith.mulf %49, %48 : vector<1x8x8xf32>
    %51 = vector.extract_strided_slice %39 {offsets = [0, 0, 0], sizes = [1, 8, 8], strides = [1, 1, 1]} : vector<1x32x8xf32> to vector<1x8x8xf32>
    %52 = vector.extract_strided_slice %10 {offsets = [0, 0, 0], sizes = [1, 8, 8], strides = [1, 1, 1]} : vector<1x8x32xf32> to vector<1x8x8xf32>
    "tpu.trace_start"() <{level = 10 : i32, message = "bqk,bkc->bqc"}> : () -> ()
    %cst_44 = arith.constant dense<0.000000e+00> : vector<1x8x8xf32>
    %53 = tpu.matmul %51, %52, %cst_44 {dimension_numbers = #tpu.dot_dimension_numbers<[2], [1], [1], [2], [0, 0, 0, 1, 1, 2], [0], [0]>} : vector<1x8x8xf32>, vector<1x8x8xf32>, vector<1x8x8xf32> -> vector<1x8x8xf32>
    "tpu.trace_stop"() : () -> ()
    %54 = arith.addf %50, %53 : vector<1x8x8xf32>
    %c0_45 = arith.constant 0 : index
    %c0_46 = arith.constant 0 : index
    %c0_47 = arith.constant 0 : index
    %55 = vector.load %arg14[%c0_45, %c0_46, %c0_47] : memref<1x32x8xf32, #tpu.memory_space<vmem>>, vector<1x8x8xf32>
    tpu.vector_store %arg14[%c0_45, %c0_46, %c0_47], %54 {strides = array<i32>} : memref<1x32x8xf32, #tpu.memory_space<vmem>>, vector<1x8x8xf32>,
    %56 = vector.extract_strided_slice %36 {offsets = [0, 8, 0], sizes = [1, 8, 1], strides = [1, 1, 1]} : vector<1x32x1xf32> to vector<1x8x1xf32>
    %c0_48 = arith.constant 0 : index
    %c8_49 = arith.constant 8 : index
    %c0_50 = arith.constant 0 : index
    %57 = vector.load %arg14[%c0_48, %c8_49, %c0_50] : memref<1x32x8xf32, #tpu.memory_space<vmem>>, vector<1x8x8xf32>
    %58 = vector.broadcast %56 : vector<1x8x1xf32> to vector<1x8x8xf32>
    %59 = arith.mulf %58, %57 : vector<1x8x8xf32>
    %60 = vector.extract_strided_slice %39 {offsets = [0, 8, 0], sizes = [1, 8, 8], strides = [1, 1, 1]} : vector<1x32x8xf32> to vector<1x8x8xf32>
    %61 = vector.extract_strided_slice %10 {offsets = [0, 0, 8], sizes = [1, 8, 8], strides = [1, 1, 1]} : vector<1x8x32xf32> to vector<1x8x8xf32>
    "tpu.trace_start"() <{level = 10 : i32, message = "bqk,bkc->bqc"}> : () -> ()
    %cst_51 = arith.constant dense<0.000000e+00> : vector<1x8x8xf32>
    %62 = tpu.matmul %60, %61, %cst_51 {dimension_numbers = #tpu.dot_dimension_numbers<[2], [1], [1], [2], [0, 0, 0, 1, 1, 2], [0], [0]>} : vector<1x8x8xf32>, vector<1x8x8xf32>, vector<1x8x8xf32> -> vector<1x8x8xf32>
    "tpu.trace_stop"() : () -> ()
    %63 = arith.addf %59, %62 : vector<1x8x8xf32>
    %c0_52 = arith.constant 0 : index
    %c8_53 = arith.constant 8 : index
    %c0_54 = arith.constant 0 : index
    %64 = vector.load %arg14[%c0_52, %c8_53, %c0_54] : memref<1x32x8xf32, #tpu.memory_space<vmem>>, vector<1x8x8xf32>
    tpu.vector_store %arg14[%c0_52, %c8_53, %c0_54], %63 {strides = array<i32>} : memref<1x32x8xf32, #tpu.memory_space<vmem>>, vector<1x8x8xf32>,
    %65 = vector.extract_strided_slice %36 {offsets = [0, 16, 0], sizes = [1, 8, 1], strides = [1, 1, 1]} : vector<1x32x1xf32> to vector<1x8x1xf32>
    %c0_55 = arith.constant 0 : index
    %c16_56 = arith.constant 16 : index
    %c0_57 = arith.constant 0 : index
    %66 = vector.load %arg14[%c0_55, %c16_56, %c0_57] : memref<1x32x8xf32, #tpu.memory_space<vmem>>, vector<1x8x8xf32>
    %67 = vector.broadcast %65 : vector<1x8x1xf32> to vector<1x8x8xf32>
    %68 = arith.mulf %67, %66 : vector<1x8x8xf32>
    %69 = vector.extract_strided_slice %39 {offsets = [0, 16, 0], sizes = [1, 8, 8], strides = [1, 1, 1]} : vector<1x32x8xf32> to vector<1x8x8xf32>
    %70 = vector.extract_strided_slice %10 {offsets = [0, 0, 16], sizes = [1, 8, 8], strides = [1, 1, 1]} : vector<1x8x32xf32> to vector<1x8x8xf32>
    "tpu.trace_start"() <{level = 10 : i32, message = "bqk,bkc->bqc"}> : () -> ()
    %cst_58 = arith.constant dense<0.000000e+00> : vector<1x8x8xf32>
    %71 = tpu.matmul %69, %70, %cst_58 {dimension_numbers = #tpu.dot_dimension_numbers<[2], [1], [1], [2], [0, 0, 0, 1, 1, 2], [0], [0]>} : vector<1x8x8xf32>, vector<1x8x8xf32>, vector<1x8x8xf32> -> vector<1x8x8xf32>
    "tpu.trace_stop"() : () -> ()
    %72 = arith.addf %68, %71 : vector<1x8x8xf32>
    %c0_59 = arith.constant 0 : index
    %c16_60 = arith.constant 16 : index
    %c0_61 = arith.constant 0 : index
    %73 = vector.load %arg14[%c0_59, %c16_60, %c0_61] : memref<1x32x8xf32, #tpu.memory_space<vmem>>, vector<1x8x8xf32>
    tpu.vector_store %arg14[%c0_59, %c16_60, %c0_61], %72 {strides = array<i32>} : memref<1x32x8xf32, #tpu.memory_space<vmem>>, vector<1x8x8xf32>,
    %74 = vector.extract_strided_slice %36 {offsets = [0, 24, 0], sizes = [1, 8, 1], strides = [1, 1, 1]} : vector<1x32x1xf32> to vector<1x8x1xf32>
    %c0_62 = arith.constant 0 : index
    %c24_63 = arith.constant 24 : index
    %c0_64 = arith.constant 0 : index
    %75 = vector.load %arg14[%c0_62, %c24_63, %c0_64] : memref<1x32x8xf32, #tpu.memory_space<vmem>>, vector<1x8x8xf32>
    %76 = vector.broadcast %74 : vector<1x8x1xf32> to vector<1x8x8xf32>
    %77 = arith.mulf %76, %75 : vector<1x8x8xf32>
    %78 = vector.extract_strided_slice %39 {offsets = [0, 24, 0], sizes = [1, 8, 8], strides = [1, 1, 1]} : vector<1x32x8xf32> to vector<1x8x8xf32>
    %79 = vector.extract_strided_slice %10 {offsets = [0, 0, 24], sizes = [1, 8, 8], strides = [1, 1, 1]} : vector<1x8x32xf32> to vector<1x8x8xf32>
    "tpu.trace_start"() <{level = 10 : i32, message = "bqk,bkc->bqc"}> : () -> ()
    %cst_65 = arith.constant dense<0.000000e+00> : vector<1x8x8xf32>
    %80 = tpu.matmul %78, %79, %cst_65 {dimension_numbers = #tpu.dot_dimension_numbers<[2], [1], [1], [2], [0, 0, 0, 1, 1, 2], [0], [0]>} : vector<1x8x8xf32>, vector<1x8x8xf32>, vector<1x8x8xf32> -> vector<1x8x8xf32>
    "tpu.trace_stop"() : () -> ()
    %81 = arith.addf %77, %80 : vector<1x8x8xf32>
    %c0_66 = arith.constant 0 : index
    %c24_67 = arith.constant 24 : index
    %c0_68 = arith.constant 0 : index
    %82 = vector.load %arg14[%c0_66, %c24_67, %c0_68] : memref<1x32x8xf32, #tpu.memory_space<vmem>>, vector<1x8x8xf32>
    tpu.vector_store %arg14[%c0_66, %c24_67, %c0_68], %81 {strides = array<i32>} : memref<1x32x8xf32, #tpu.memory_space<vmem>>, vector<1x8x8xf32>,
    %c0_i32_69 = arith.constant 0 : i32
    %83 = arith.cmpi eq, %arg1, %c0_i32_69 : i32
    %84 = arith.extui %83 : i1 to i32
    %c0_i32_70 = arith.constant 0 : i32
    %85 = arith.cmpi ne, %84, %c0_i32_70 : i32
    scf.if %85 {
      %c0_71 = arith.constant 0 : index
      %c0_72 = arith.constant 0 : index
      %c0_73 = arith.constant 0 : index
      %86 = vector.load %arg13[%c0_71, %c0_72, %c0_73] : memref<1x32x1xf32, #tpu.memory_space<vmem>>, vector<1x32x1xf32>
      %87 = tpu.reciprocal %86 {approx = true} : vector<1x32x1xf32> -> vector<1x32x1xf32>
      %c0_74 = arith.constant 0 : index
      %c0_75 = arith.constant 0 : index
      %c0_76 = arith.constant 0 : index
      %88 = vector.load %arg10[%c0_74, %c0_75, %c0_76] : memref<1x8x32xf32, #tpu.memory_space<vmem>>, vector<1x8x32xf32>
      %c0_77 = arith.constant 0 : index
      %c0_78 = arith.constant 0 : index
      %c0_79 = arith.constant 0 : index
      %89 = vector.load %arg14[%c0_77, %c0_78, %c0_79] : memref<1x32x8xf32, #tpu.memory_space<vmem>>, vector<1x8x8xf32>
      %90 = vector.extract_strided_slice %87 {offsets = [0, 0, 0], sizes = [1, 8, 1], strides = [1, 1, 1]} : vector<1x32x1xf32> to vector<1x8x1xf32>
      %91 = vector.broadcast %90 : vector<1x8x1xf32> to vector<1x8x8xf32>
      %92 = arith.mulf %89, %91 : vector<1x8x8xf32>
      %93 = vector.extract_strided_slice %88 {offsets = [0, 0, 0], sizes = [1, 8, 8], strides = [1, 1, 1]} : vector<1x8x32xf32> to vector<1x8x8xf32>
      %94 = arith.mulf %92, %93 : vector<1x8x8xf32>
      %c0_80 = arith.constant 0 : index
      %c0_81 = arith.constant 0 : index
      %c0_82 = arith.constant 0 : index
      %95 = vector.load %arg8[%c0_80, %c0_81, %c0_82] : memref<1x8x32xf32, #tpu.memory_space<vmem>>, vector<1x8x8xf32>
      tpu.vector_store %arg8[%c0_80, %c0_81, %c0_82], %94 {strides = array<i32>} : memref<1x8x32xf32, #tpu.memory_space<vmem>>, vector<1x8x8xf32>,
      %c0_83 = arith.constant 0 : index
      %c8_84 = arith.constant 8 : index
      %c0_85 = arith.constant 0 : index
      %96 = vector.load %arg14[%c0_83, %c8_84, %c0_85] : memref<1x32x8xf32, #tpu.memory_space<vmem>>, vector<1x8x8xf32>
      %97 = vector.extract_strided_slice %87 {offsets = [0, 8, 0], sizes = [1, 8, 1], strides = [1, 1, 1]} : vector<1x32x1xf32> to vector<1x8x1xf32>
      %98 = vector.broadcast %97 : vector<1x8x1xf32> to vector<1x8x8xf32>
      %99 = arith.mulf %96, %98 : vector<1x8x8xf32>
      %100 = vector.extract_strided_slice %88 {offsets = [0, 0, 8], sizes = [1, 8, 8], strides = [1, 1, 1]} : vector<1x8x32xf32> to vector<1x8x8xf32>
      %101 = arith.mulf %99, %100 : vector<1x8x8xf32>
      %c0_86 = arith.constant 0 : index
      %c0_87 = arith.constant 0 : index
      %c8_88 = arith.constant 8 : index
      %102 = vector.load %arg8[%c0_86, %c0_87, %c8_88] : memref<1x8x32xf32, #tpu.memory_space<vmem>>, vector<1x8x8xf32>
      tpu.vector_store %arg8[%c0_86, %c0_87, %c8_88], %101 {strides = array<i32>} : memref<1x8x32xf32, #tpu.memory_space<vmem>>, vector<1x8x8xf32>,
      %c0_89 = arith.constant 0 : index
      %c16_90 = arith.constant 16 : index
      %c0_91 = arith.constant 0 : index
      %103 = vector.load %arg14[%c0_89, %c16_90, %c0_91] : memref<1x32x8xf32, #tpu.memory_space<vmem>>, vector<1x8x8xf32>
      %104 = vector.extract_strided_slice %87 {offsets = [0, 16, 0], sizes = [1, 8, 1], strides = [1, 1, 1]} : vector<1x32x1xf32> to vector<1x8x1xf32>
      %105 = vector.broadcast %104 : vector<1x8x1xf32> to vector<1x8x8xf32>
      %106 = arith.mulf %103, %105 : vector<1x8x8xf32>
      %107 = vector.extract_strided_slice %88 {offsets = [0, 0, 16], sizes = [1, 8, 8], strides = [1, 1, 1]} : vector<1x8x32xf32> to vector<1x8x8xf32>
      %108 = arith.mulf %106, %107 : vector<1x8x8xf32>
      %c0_92 = arith.constant 0 : index
      %c0_93 = arith.constant 0 : index
      %c16_94 = arith.constant 16 : index
      %109 = vector.load %arg8[%c0_92, %c0_93, %c16_94] : memref<1x8x32xf32, #tpu.memory_space<vmem>>, vector<1x8x8xf32>
      tpu.vector_store %arg8[%c0_92, %c0_93, %c16_94], %108 {strides = array<i32>} : memref<1x8x32xf32, #tpu.memory_space<vmem>>, vector<1x8x8xf32>,
      %c0_95 = arith.constant 0 : index
      %c24_96 = arith.constant 24 : index
      %c0_97 = arith.constant 0 : index
      %110 = vector.load %arg14[%c0_95, %c24_96, %c0_97] : memref<1x32x8xf32, #tpu.memory_space<vmem>>, vector<1x8x8xf32>
      %111 = vector.extract_strided_slice %87 {offsets = [0, 24, 0], sizes = [1, 8, 1], strides = [1, 1, 1]} : vector<1x32x1xf32> to vector<1x8x1xf32>
      %112 = vector.broadcast %111 : vector<1x8x1xf32> to vector<1x8x8xf32>
      %113 = arith.mulf %110, %112 : vector<1x8x8xf32>
      %114 = vector.extract_strided_slice %88 {offsets = [0, 0, 24], sizes = [1, 8, 8], strides = [1, 1, 1]} : vector<1x8x32xf32> to vector<1x8x8xf32>
      %115 = arith.mulf %113, %114 : vector<1x8x8xf32>
      %c0_98 = arith.constant 0 : index
      %c0_99 = arith.constant 0 : index
      %c24_100 = arith.constant 24 : index
      %116 = vector.load %arg8[%c0_98, %c0_99, %c24_100] : memref<1x8x32xf32, #tpu.memory_space<vmem>>, vector<1x8x8xf32>
      tpu.vector_store %arg8[%c0_98, %c0_99, %c24_100], %115 {strides = array<i32>} : memref<1x8x32xf32, #tpu.memory_space<vmem>>, vector<1x8x8xf32>,
    } else {
    }
    return
  }
  func.func @transform_0(%arg0: i32, %arg1: i32) -> (i32, i32, i32) {
    %c0_i32 = arith.constant 0 : i32
    %c0_i32_0 = arith.constant 0 : i32
    %c0_i32_1 = arith.constant 0 : i32
    return %arg0, %c0_i32, %c0_i32_0 : i32, i32, i32
  }
  func.func @transform_1(%arg0: i32, %arg1: i32) -> (i32, i32, i32) {
    %c0_i32 = arith.constant 0 : i32
    %c0_i32_0 = arith.constant 0 : i32
    return %arg0, %arg1, %c0_i32 : i32, i32, i32
  }
  func.func @transform_2(%arg0: i32, %arg1: i32) -> (i32, i32, i32) {
    %c0_i32 = arith.constant 0 : i32
    %c0_i32_0 = arith.constant 0 : i32
    return %arg0, %c0_i32, %arg1 : i32, i32, i32
  }
  func.func @transform_3(%arg0: i32, %arg1: i32) -> (i32, i32) {
    %c0_i32 = arith.constant 0 : i32
    %c0_i32_0 = arith.constant 0 : i32
    %c0_i32_1 = arith.constant 0 : i32
    return %c0_i32, %c0_i32_0 : i32, i32
  }
  func.func @transform_4(%arg0: i32, %arg1: i32) -> (i32, i32) {
    %c0_i32 = arith.constant 0 : i32
    %c0_i32_0 = arith.constant 0 : i32
    %c0_i32_1 = arith.constant 0 : i32
    return %c0_i32, %c0_i32_0 : i32, i32
  }
  func.func @transform_5(%arg0: i32, %arg1: i32) -> (i32, i32) {
    %c0_i32 = arith.constant 0 : i32
    %c0_i32_0 = arith.constant 0 : i32
    %c0_i32_1 = arith.constant 0 : i32
    return %c0_i32, %c0_i32_0 : i32, i32
  }
  func.func @transform_6(%arg0: i32, %arg1: i32) -> (i32, i32, i32) {
    %c0_i32 = arith.constant 0 : i32
    %c0_i32_0 = arith.constant 0 : i32
    %c0_i32_1 = arith.constant 0 : i32
    return %arg0, %c0_i32, %c0_i32_0 : i32, i32, i32
  }
}

</mosaic_0001>

<bundles_post_ra>
// kernel: tpu_custom_call.1
= control target key start
LH: loop header
LB: loop body
LE: loop exit
PB: predicated region body
PF: predicated region fallthrough
CT: control target
= control target key end

     0   :  { %s1598_s0 = inlined_call_operand.vmem [shape: f32[2,8,32], index: 0, kind: input, shape index: {}]   ;;  %s1599_s1 = inlined_call_operand.hbm [shape: f32[2,8,32], index: 1, kind: input, shape index: {}]   ;;  %s1600_s2 = inlined_call_operand.vmem [shape: f32[2,32,8], index: 2, kind: input, shape index: {}]   ;;  %s1601_s3 = inlined_call_operand.vmem [shape: f32[32,64], index: 3, kind: input, shape index: {}]   ;;  %s1602_s4 = inlined_call_operand.vmem [shape: f32[1,64], index: 4, kind: input, shape index: {}]   ;;  %s1603_s5 = inlined_call_operand.vmem [shape: f32[32,64], index: 5, kind: input, shape index: {}]   ;;  %s1604_s6 = inlined_call_operand.hbm [shape: f32[2,8,32], index: 6, kind: output, shape index: {}]  }
   0x1   :  { %1606 = sst [smem:[#allocation14_spill]] %s1599_s1 }
   0x2   :  { %11 = vsyncpa [#allocation9], 0 }
   0x3   :  { %13 = vsyncpa [#allocation9 + $0x1], 0 }
   0x4   :  { %14 = vsyncpa [#allocation10], 0 }
   0x5   :  { %16 = vsyncpa [#allocation10 + $0x1], 0  ;;  %s1301_s21 = smov 0   ;;  %s1303_s22 = smov 0  }
   0x6   :  { %s1305_s23 = smov 0   ;;  %s1307_s24 = smov 0  }
   0x7   :  { %s1309_s25 = smov 0   ;;  %s1311_s26 = smov 0  }
   0x8 LB: > { %s1000_s27 = sadd.s32 4294967295, %s1251_s26   ;;  %s1001_s28 = sadd.s32 4294967294, %s1251_s26   ;;  %s1251_s26 = sphi %s1311_s26, %s22_s26   ;;  %s1247_s25 = sphi %s1309_s25, %s1617_s25   ;;  %s1243_s24 = sphi %s1307_s24, %s1616_s24   ;;  %s1239_s23 = sphi %s1305_s23, %s1615_s23   ;;  %s1235_s22 = sphi %s1303_s22, %s1614_s22   ;;  %s1231_s21 = sphi %s1301_s21, %s1613_s21  }
   0x9   : > { %s34_s29 = sadd.s32 1, %s1247_s25  ;;  %s69_s30 = sadd.s32 1, %s1239_s23 }
   0xa   : > { %p36_p0 = scmp.ge.s32.totalorder %s34_s29, 2  ;;  %p76_p1 = scmp.ne.s32.totalorder %s1239_s23, %s1235_s22 }
   0xb   : > { %p77_p2 = scmp.eq.s32.totalorder %s1251_s26, 0  ;;  %p82_p3 = scmp.ne.s32.totalorder %s1235_s22, %s1231_s21 }
   0xc   : > { %s1619_s29 = smov (%p36_p0, %s34_s29), 0  ;;  %p83_p5 = scmp.eq.s32.totalorder %s1000_s27, 0 }
   0xd   : > { %p1342_p4 = por %p77_p2, %p76_p1  ;;  %s64_s8 = ssub.s32 %s1247_s25, %s1619_s29 }
   0xe   : > { %p197_p6 = scmp.eq.s32.totalorder %s1000_s27, 1  ;;  %p67_p7 = scmp.eq.s32.totalorder %s64_s8, 0 }
   0xf   : > { %p1348_p8 = por %p83_p5, %p82_p3  ;;  %p203_p10 = scmp.eq.s32.totalorder %s1001_s28, 1 }
  0x10   : > { %p1352_p9 = por %p197_p6, %p76_p1  ;;  %p1003_p12 = scmp.ge.s32.totalorder %s1251_s26, 2 }
  0x11   : > { %s1357_s11 = scalar_select %p67_p7, %s1239_s23, %s69_s30  }
  0x12   : > { %p1359_p11 = por %p203_p10, %p82_p3  ;;  %p1044_p13 = scmp.lt.s32.totalorder %s1251_s26, 2 }
  0x13   : > { %s239_s13 = sand.u32 1, %s1239_s23   ;;  %s1005_s15 = sshll.u32 %s1247_s25, 3 }
  0x14   : > { %s1004_s14 = sshll.u32 %s239_s13, 3  ;;  %s1611_s1 = sld [smem:[#allocation14_spill]] }
  0x15   : > { %s243_s19 = scalar_lea.vmem [#allocation8], %s1004_s14  ;;  %p1037_p0 = pnand %p1044_p13, %p1342_p4 }
  0x16   : > { %s252_s20 = sshll.u32 %s243_s19, 4  ;;  %p1006_p1 = scmp.ge.s32.totalorder %s1251_s26, 1  ;;  %s253_s20 = int_to_ptr.vmem [resolvable:$true] %s252_s20 }
  0x17   : > { %p268_p2 = scmp.lt.s32.totalorder %s1251_s26, 3  ;;  %s240_s28 = scalar_lea.sflag [#allocation9], %s239_s13 }
  0x19   : > { %p269_p3 = pnand %p1006_p1, %p268_p2 }
  0x1a   : > { %s248_s18 = scalar_lea.hbm %s1611_s1, %s1005_s15  ;;  %s1375_s30 = sand.u32 (!%p269_p3), 1, %s1235_s22  }
  0x1b   : > { %s250_s27 = sshll.u32 %s248_s18, 4  ;;  %272 = sbr.rel (%p269_p3) target bundleno = 1079 (0x437), region = 44  ;;  %s251_s27 = int_to_ptr.hbm [resolvable:$true] %s250_s27 }
  0x1c   : > { %1039 = dma.hbm_to_vmem [thread:$0]  (!%p1037_p0), %s251_s27, 128, %s253_s20, %s240_s28  }
  0x1d   : > { %s1605_s8 = sshll.u32 (!%p269_p3), %s1375_s30, 3  ;;  %s275_s14 = scalar_lea.sflag (!%p269_p3), [#allocation9], %s1375_s30 }
  0x1e   : > { %s278_s15 = scalar_lea.vmem (!%p269_p3), [#allocation8], %s1605_s8 }
  0x20   : > { %1222 = dma.done.wait (%p1348_p8), %s275_s14, 128  }
  0x21   : > { %1224 = vsyncadd (%p1348_p8), %s275_s14, 4294967168  ;;  %p320_p4 = scmp.lt.s32.totalorder %s1243_s24, 1  ;;  %v340_v0 = vld [vmem:[%s1601_s3 + $0x18] sm:$0xff]  ;;  %v339_v2 = vld [vmem:[%s1601_s3 + $0x10] sm:$0xff]  ;;  %vm345_vm0 = vcmask 261120   ;;  %vm403_vm1 = vcmask 64512  }
  0x22   : > { %v412_v1 = vld [vmem:[%s1603_s5 + $0x18] sm:$0xff]  ;;  %361 = vmatpush.msra.mxu0 %v340_v0  ;;  %v411_v3 = vld [vmem:[%s1603_s5 + $0x10] sm:$0xff]  ;;  %v338_v4 = vld [vmem:[%s1601_s3 + $0x8] sm:$0xff]  ;;  %s1253_s14 = smov 112   ;;  %vm394_vm2 = vcmask 7168   ;;  %v1256_v22 = vmov -inf  }
  0x23   : > { %s1387_s7 = scalar_select %p320_p4, %s1243_s24, 1  ;;  %429 = vmatpush.msra.mxu1 %v412_v1  ;;  %v410_v5 = vld [vmem:[%s1603_s5 + $0x8] sm:$0xff]  ;;  %v337_v6 = vld [vmem:[%s1601_s3] sm:$0xff]  ;;  %v408_v9 = vld [vmem:[%s278_s15] sm:$0xff]  ;;  %397 = vst.msk [vmem:[#allocation5 + $0x10] sm:$0xff] %vm394_vm2, %v1256_v22  ;;  %v1257_v42 = vmov 0  }
  0x24   : > { %362 = vmatpush.msra.mxu0 %v339_v2  ;;  %v409_v7 = vld [vmem:[%s1603_s5] sm:$0xff]  ;;  %s1255_s15 = smov 104   ;;  %395 = vst.msk [vmem:[#allocation5] sm:$0xff] %vm394_vm2, %v1256_v22  ;;  %1107 = vset.pattern.permute.xlu2 %v1257_v42  ;;  %v1258_v43 = vmov 0.0   ;;  %s1260_s20 = smov 88   ;;  %vm839_vm7 = vcmask 130112  }
  0x25   : > { %s1009_s13 = sshll.u32 %s1387_s7, 3  ;;  %430 = vmatpush.msra.mxu1 %v411_v3  ;;  %v1110_v10 = vld [vmem:[%s1602_s4] ss:$0 sm:$0xff]  ;;  %396 = vst.msk [vmem:[#allocation5 + $0x8] sm:$0xff] %vm394_vm2, %v1256_v22  ;;  %s1031_s16 = sshll.u32 %s1387_s7, 5  ;;  %1109 = vset.pattern.permute.xlu0 %v1257_v42  ;;  %vm856_vm8 = vcmask 195712  }
  0x26   : > { %s323_s1 = scalar_lea.vmem %s1598_s0, %s1009_s13  ;;  %363 = vmatpush.msra.mxu0 %v338_v4  ;;  %398 = vst.msk [vmem:[#allocation5 + $0x18] sm:$0xff] %vm394_vm2, %v1256_v22  ;;  %s331_s19 = scalar_lea.vmem %s1600_s2, %s1031_s16  ;;  %1108 = vset.pattern.permute.xlu1 %v1257_v42  ;;  %vm873_vm9 = vcmask 261312  }
  0x27   : > { %431 = vmatpush.msra.mxu1 %v410_v5  ;;  %v336_v8 = vld [vmem:[%s323_s1] sm:$0xff]  ;;  %s1254_s1 = smov 120   ;;  %v559_v24 = vld [vmem:[%s331_s19 + $0x10] sm:$0xff]  ;;  %v558_v31 = vld [vmem:[%s331_s19 + $0x8] sm:$0xff]  ;;  %405 = vst.msk [vmem:[#allocation7 + $0x8] sm:$0xff] %vm403_vm1, %v1258_v43  ;;  %s1259_s7 = smov 80  }
  0x28   : > { %364 = vmatpush.msra.mxu0 %v337_v6  ;;  %v557_v30 = vld [vmem:[%s331_s19] sm:$0xff]  ;;  %v560_v38 = vld [vmem:[%s331_s19 + $0x18] sm:$0xff]  ;;  %399 = vst.msk [vmem:[#allocation6] sm:$0xff] %vm394_vm2, %v1258_v43  ;;  %s1261_s27 = smov 72   ;;  %s1262_s9 = smov 96  }
  0x29   : > { %432 = vmatpush.msra.mxu1 %v409_v7  ;;  %1012 = vmatmul.msk.f32.vlgmr.msra.gmra.mxu0 %vm345_vm0, %v336_v8  ;;  %400 = vst.msk [vmem:[#allocation6 + $0x8] sm:$0xff] %vm394_vm2, %v1258_v43  ;;  %s1263_s28 = smov 16   ;;  %s1264_s8 = smov 8  }
  0x2a   : > { %1014 = vmatmul.msk.f32.vlgmr.msra.gmra.mxu1 %vm345_vm0, %v408_v9  ;;  %401 = vst.msk [vmem:[#allocation6 + $0x10] sm:$0xff] %vm394_vm2, %v1258_v43  ;;  %v1482_v44 = vld [vmem:[#allocation5 + $0x10] sm:$0xff]  ;;  %s1612_s13 = sshll.u32 %s1375_s30, 3 }
  0x2b   : > { %402 = vst.msk [vmem:[#allocation6 + $0x18] sm:$0xff] %vm394_vm2, %v1258_v43  ;;  %v1492_v49 = vld [vmem:[#allocation5] sm:$0xff] }
  0x2c   : > { %404 = vst.msk [vmem:[#allocation7] sm:$0xff] %vm403_vm1, %v1258_v43  ;;  %v566_v48 = vld [vmem:[#allocation5 + $0x8] sm:$0xff] }
  0x2d   : > { %406 = vst.msk [vmem:[#allocation7 + $0x10] sm:$0xff] %vm403_vm1, %v1258_v43  ;;  %v1503_v57 = vld [vmem:[#allocation5 + $0x18] sm:$0xff] }
  0x2e   : > { %407 = vst.msk [vmem:[#allocation7 + $0x18] sm:$0xff] %vm403_vm1, %v1258_v43 }
  0xa6   : > { %v366_v11 = vpop.f32.mrf.mxu0 }
  0xa7   : > { %v1422_v12 = vpop.f32.mrf.mxu1  ;;  %v1424_v13 = vadd.f32 %v1110_v10, %v366_v11 }
  0xa8   : > { %497 = vrot.lane.b32.xlu1 %v1422_v12, %s1253_s14  ;;  %468 = vrot.lane.b32.xlu0 %v1422_v12, %s1254_s1 }
  0xa9   : > { %1015 = vmatpush.xpose.msk.msra.mxu2 %vm403_vm1, %v1422_v12  ;;  %369 = vst.msk [vmem:[#allocation2] sm:$0xff] %vm345_vm0, %v1424_v13  ;;  %v1013_v5 = vmul.f32 -1.442695, %v1424_v13 }
  0xb0   : > { %526 = vrot.lane.b32.xlu1 %v1422_v12, %s1255_s15  ;;  %v437_v14 = vld [vmem:[#allocation2] sm:$0xff] }
  0xb1   : > { %495 = vrot.lane.b32.xlu2 %v437_v14, %s1253_s14  ;;  %466 = vrot.lane.b32.xlu0 %v437_v14, %s1254_s1 }
  0xb2   : > { %1016 = vmatmul.msk.f32.vlgmr.msra.gmra.mxu2 %vm403_vm1, %v437_v14 }
  0xb9   : > { %524 = vrot.lane.b32.xlu2 %v437_v14, %s1255_s15 }
 0x10b   : > { %v496_v17 = vpop.permute.xlu2 %495 }
 0x113   : > { %v525_v20 = vpop.permute.xlu2 %524 }
 0x11a   : > { %v498_v15 = vpop.permute.xlu1 %497  ;;  %v469_v16 = vpop.permute.xlu0 %468 }
 0x11b   : > { %1019 = vmatpush.xpose.msk.msrb.mxu2 %vm403_vm1, %v498_v15  ;;  %1017 = vmatpush.xpose.msk.msra.mxu3 %vm403_vm1, %v469_v16 }
 0x11e   : > { %1020 = vmatmul.msk.f32.vlgmr.msrb.gmra.mxu2 %vm403_vm1, %v496_v17 }
 0x122   : > { %v527_v18 = vpop.permute.xlu1 %526 }
 0x123   : > { %1021 = vmatpush.xpose.msk.msrb.mxu3 %vm403_vm1, %v527_v18  ;;  %v467_v19 = vpop.permute.xlu0 %466 }
 0x124   : > { %1018 = vmatmul.msk.f32.vlgmr.msra.gmra.mxu3 %vm403_vm1, %v467_v19 }
 0x12c   : > { %1022 = vmatmul.msk.f32.vlgmr.msrb.gmra.mxu3 %vm403_vm1, %v525_v20 }
 0x135   : > { %v462_v21 = vpop.f32.mrf.mxu2 }
 0x136   : > { %465 = vst.msk [vmem:[#allocation4] sm:$0xff] %vm403_vm1, %v462_v21 }
 0x13d   : > { %v553_v29 = vld [vmem:[#allocation4] sm:$0xff] }
 0x13e   : > { %v1461_v34 = vadd.f32 %v557_v30, %v553_v29 }
 0x140   : > { %v569_v37 = vsel %vm403_vm1, %v1461_v34, -inf }
 0x1a1   : > { %v520_v23 = vpop.f32.mrf.mxu2 }
 0x1a2   : > { %523 = vst.msk [vmem:[#allocation4 + $0x10] sm:$0xff] %vm403_vm1, %v520_v23 }
 0x1a7   : > { %v491_v25 = vpop.f32.mrf.mxu3 }
 0x1a8   : > { %494 = vst.msk [vmem:[#allocation4 + $0x8] sm:$0xff] %vm403_vm1, %v491_v25 }
 0x1a9   : > { %v555_v26 = vld [vmem:[#allocation4 + $0x10] sm:$0xff] }
 0x1aa   : > { %v1457_v27 = vadd.f32 %v559_v24, %v555_v26 }
 0x1ac   : > { %v575_v28 = vsel %vm403_vm1, %v1457_v27, -inf }
 0x1ad   : > { %576 = vmax.xlane.f32.xlu0 %v575_v28 }
 0x1af   : > { %v549_v32 = vpop.f32.mrf.mxu3  ;;  %v554_v33 = vld [vmem:[#allocation4 + $0x8] sm:$0xff] }
 0x1b0   : > { %552 = vst.msk [vmem:[#allocation4 + $0x18] sm:$0xff] %vm403_vm1, %v549_v32  ;;  %v1464_v35 = vadd.f32 %v558_v31, %v554_v33 }
 0x1b2   : > { %v572_v36 = vsel %vm403_vm1, %v1464_v35, -inf }
 0x1b3   : > { %573 = vmax.xlane.f32.xlu2 %v572_v36 }
 0x1b5   : > { %570 = vmax.xlane.f32.xlu0 %v569_v37 }
 0x1b7   : > { %v556_v39 = vld [vmem:[#allocation4 + $0x18] sm:$0xff] }
 0x1b8   : > { %v1470_v40 = vadd.f32 %v560_v38, %v556_v39  ;;  %v631_v39 = vld [vmem:[#allocation6 + $0x10] sm:$0xff] }
 0x1ba   : > { %v578_v41 = vsel %vm403_vm1, %v1470_v40, -inf }
 0x1bb   : > { %579 = vmax.xlane.f32.xlu1 %v578_v41 }
 0x220   : > { %v577_v45 = vpop.xlane.xlu0 %576 }
 0x221   : > { %v1485_v46 = vmax.f32 %v1482_v44, %v577_v45 }
 0x223   : > { %v587_v47 = vsub.f32 %v1482_v44, %v1485_v46  ;;  %660 = vst.msk [vmem:[#allocation5 + $0x10] sm:$0xff] %vm394_vm2, %v1485_v46  ;;  %609 = vperm.xlu2 %1107, %v1485_v46   ;;  %v632_v46 = vld [vmem:[#allocation6 + $0x18] sm:$0xff] }
 0x225   : > { %v593_v37 = vmul.f32 1.442695, %v587_v47  ;;  %v697_v47 = vld [vmem:[#allocation7 + $0x8] sm:$0xff] }
 0x226   : > { %v574_v50 = vpop.xlane.xlu2 %573 }
 0x227   : > { %v582_v51 = vmax.f32 %v566_v48, %v574_v50 }
 0x228   : > { %v571_v52 = vpop.xlane.xlu0 %570 }
 0x229   : > { %v1495_v53 = vmax.f32 %v1492_v49, %v571_v52  ;;  %v586_v54 = vsub.f32 %v566_v48, %v582_v51  ;;  %659 = vst.msk [vmem:[#allocation5 + $0x8] sm:$0xff] %vm394_vm2, %v582_v51  ;;  %604 = vperm.xlu0 %1109, %v582_v51   ;;  %v630_v48 = vld [vmem:[#allocation6 + $0x8] sm:$0xff] }
 0x22b   : > { %v585_v55 = vsub.f32 %v1492_v49, %v1495_v53  ;;  %658 = vst.msk [vmem:[#allocation5] sm:$0xff] %vm394_vm2, %v1495_v53  ;;  %739 = vrot.lane.b32.xlu2 %v1422_v12, %s1259_s7  ;;  %v591_v56 = vmul.f32 1.442695, %v586_v54  ;;  %v732_v49 = vld [vmem:[#allocation7 + $0x10] sm:$0xff] }
 0x22d   : > { %1111 = vpow2.f32 %v591_v56 }
 0x22e   : > { %v580_v58 = vpop.xlane.xlu1 %579 }
 0x22f   : > { %v1506_v59 = vmax.f32 %v1503_v57, %v580_v58 }
 0x231   : > { %v588_v60 = vsub.f32 %v1503_v57, %v1506_v59  ;;  %661 = vst.msk [vmem:[#allocation5 + $0x18] sm:$0xff] %vm394_vm2, %v1506_v59  ;;  %614 = vperm.xlu1 %1108, %v1506_v59  }
 0x233   : > { %704 = vrot.lane.b32.xlu2 %v1422_v12, %s1260_s20  ;;  %v1514_v61 = vpop.eup %1111  ;;  %v595_v32 = vmul.f32 1.442695, %v588_v60  ;;  %v589_v60 = vmul.f32 1.442695, %v585_v55  ;;  %s876_s20 = scalar_lea.sflag [#allocation10], %s1375_s30 }
 0x234   : > { %700 = vperm.xlu0 %1109, %v1514_v61   ;;  %v634_v50 = vmul.f32 %v1514_v61, %v630_v48 }
 0x239   : > { %774 = vrot.lane.b32.xlu1 %v1422_v12, %s1261_s27 }
 0x23b   : > { %669 = vrot.lane.b32.xlu2 %v1422_v12, %s1262_s9 }
 0x241   : > { %599 = vperm.xlu1 %1108, %v1495_v53   ;;  %v767_v53 = vld [vmem:[#allocation7 + $0x18] sm:$0xff] }
 0x27d   : > { %v610_v62 = vpop.permute.xlu2 %609 }
 0x27e   : > { %v619_v63 = vsub.f32 %v1457_v27, %v610_v62 }
 0x280   : > { %v625_v0 = vmul.f32 1.442695, %v619_v63 }
 0x282   : > { %1113 = vpow2.f32 %v625_v0  ;;  %v629_v0 = vld [vmem:[#allocation6] sm:$0xff] }
 0x283   : > { %1115 = vpow2.f32 %v1013_v5 }
 0x285   : > { %v740_v1 = vpop.permute.xlu2 %739 }
 0x286   : > { %760 = vmatpush.msra.mxu2 %v740_v1 }
 0x288   : > { %v1114_v2 = vpop.eup %1113 }
 0x289   : > { %1025 = vmatmul.msk.f32.vlgmr.msra.gmra.mxu2 %vm403_vm1, %v1114_v2  ;;  %v643_v3 = vsel %vm403_vm1, %v1114_v2, 0.0  ;;  %v1116_v9 = vpop.eup %1115 }
 0x28a   : > { %644 = vadd.xlane.f32.xlu2 %v643_v3  ;;  %v373_v11 = vadd.f32 1.0, %v1116_v9 }
 0x28c   : > { %v385_v28 = vand.u32 2147483648, %v373_v11  ;;  %vm379_vm4 = vweird.f32 %v373_v11  ;;  %v383_v29 = vand.u32 2147483647, %v373_v11 }
 0x28d   : > { %v705_v4 = vpop.permute.xlu2 %704 }
 0x28e   : > { %725 = vmatpush.msrb.mxu1 %v705_v4  ;;  %v386_v33 = vor.u32 1.1754944e-38, %v385_v28  ;;  %vm384_vm6 = vcmp.eq.f32.partialorder %v383_v29, 8.507059e+37 }
 0x295   : > { %v670_v6 = vpop.permute.xlu2 %669 }
 0x296   : > { %690 = vmatpush.msrb.mxu0 %v670_v6 }
 0x29b   : > { %v605_v7 = vpop.permute.xlu0 %604 }
 0x29c   : > { %v618_v8 = vsub.f32 %v1464_v35, %v605_v7 }
 0x29e   : > { %v623_v10 = vmul.f32 1.442695, %v618_v8 }
 0x2a0   : > { %1117 = vpow2.f32 %v623_v10 }
 0x2a1   : > { %1119 = vrcp.f32 %v373_v11 }
 0x2a3   : > { %v615_v12 = vpop.permute.xlu1 %614 }
 0x2a4   : > { %v620_v14 = vsub.f32 %v1470_v40, %v615_v12 }
 0x2a6   : > { %v1118_v15 = vpop.eup %1117  ;;  %v627_v16 = vmul.f32 1.442695, %v620_v14  ;;  %v701_v51 = vpop.permute.xlu0 %700 }
 0x2a7   : > { %1024 = vmatmul.msk.f32.vlgmr.msrb.gmra.mxu1 %vm403_vm1, %v1118_v15  ;;  %v640_v13 = vsel %vm403_vm1, %v1118_v15, 0.0  ;;  %v1120_v17 = vpop.eup %1119  ;;  %v703_v56 = vmul.f32 %v701_v51, %v697_v47 }
 0x2a8   : > { %1121 = vpow2.f32 %v627_v16  ;;  %641 = vadd.xlane.f32.xlu1 %v640_v13  ;;  %v375_v19 = vmul.f32 %v1120_v17, %v373_v11  ;;  %vm380_vm3 = vweird.f32 %v1120_v17 }
 0x2a9   : > { %vm381_vm5 = vmor %vm379_vm4, %vm380_vm3 }
 0x2aa   : > { %v376_v22 = vsub.f32 1.0, %v375_v19  ;;  %v662_v19 = vld [vmem:[#allocation7] sm:$0xff] }
 0x2ab   : > { %v775_v18 = vpop.permute.xlu1 %774 }
 0x2ac   : > { %795 = vmatpush.msra.mxu3 %v775_v18  ;;  %v377_v25 = vmul.f32 %v1120_v17, %v376_v22 }
 0x2ae   : > { %v1122_v20 = vpop.eup %1121  ;;  %v378_v27 = vadd.f32 %v1120_v17, %v377_v25 }
 0x2af   : > { %1026 = vmatmul.msk.f32.vlgmr.msra.gmra.mxu3 %vm403_vm1, %v1122_v20  ;;  %v646_v21 = vsel %vm403_vm1, %v1122_v20, 0.0 }
 0x2b0   : > { %647 = vadd.xlane.f32.xlu0 %v646_v21  ;;  %v382_v30 = vsel %vm381_vm5, %v1120_v17, %v378_v27 }
 0x2b1   : > { %v387_v35 = vsel %vm384_vm6, %v386_v33, %v382_v30 }
 0x2b3   : > { %v600_v23 = vpop.permute.xlu1 %599 }
 0x2b4   : > { %v617_v24 = vsub.f32 %v1461_v34, %v600_v23 }
 0x2b6   : > { %v621_v26 = vmul.f32 1.442695, %v617_v24 }
 0x2b8   : > { %1123 = vpow2.f32 %v621_v26 }
 0x2b9   : > { %1125 = vpow2.f32 %v595_v32 }
 0x2ba   : > { %1127 = vpow2.f32 %v593_v37 }
 0x2be   : > { %v1124_v31 = vpop.eup %1123 }
 0x2bf   : > { %1023 = vmatmul.msk.f32.vlgmr.msrb.gmra.mxu0 %vm403_vm1, %v1124_v31  ;;  %v637_v34 = vsel %vm403_vm1, %v1124_v31, 0.0  ;;  %v1126_v36 = vpop.eup %1125 }
 0x2c0   : > { %638 = vadd.xlane.f32.xlu2 %v637_v34  ;;  %v1128_v38 = vpop.eup %1127  ;;  %v636_v54 = vmul.f32 %v1126_v36, %v632_v46 }
 0x2c1   : > { %390 = vrot.lane.b32.xlu1 %v387_v35, %s1262_s9  ;;  %v635_v40 = vmul.f32 %v1128_v38, %v631_v39 }
 0x2c9   : > { %770 = vperm.xlu1 %1108, %v1126_v36  }
 0x2d8   : > { %735 = vperm.xlu2 %1107, %v1128_v38  }
 0x2fd   : > { %v645_v41 = vpop.xlane.xlu2 %644 }
 0x2fe   : > { %v651_v42 = vadd.f32 %v645_v41, %v635_v40 }
 0x300   : > { %656 = vst.msk [vmem:[#allocation6 + $0x10] sm:$0xff] %vm394_vm2, %v651_v42 }
 0x307   : > { %v807_v43 = vld [vmem:[#allocation6 + $0x10] sm:$0xff] }
 0x308   : > { %1129 = vrcp.f32 %v807_v43 }
 0x309   : > { %1131 = vpow2.f32 %v589_v60 }
 0x30c   : > { %v762_v11 = vpop.f32.mrf.mxu2 }
 0x30e   : > { %v1130_v45 = vpop.eup %1129 }
 0x30f   : > { %844 = vperm.xlu1 %1108, %v1130_v45   ;;  %v1132_v63 = vpop.eup %1131 }
 0x310   : > { %v633_v1 = vmul.f32 %v1132_v63, %v629_v0 }
 0x31b   : > { %v642_v52 = vpop.xlane.xlu1 %641 }
 0x31c   : > { %v650_v44 = vadd.f32 %v642_v52, %v634_v50 }
 0x31e   : > { %655 = vst.msk [vmem:[#allocation6 + $0x8] sm:$0xff] %vm394_vm2, %v650_v44 }
 0x323   : > { %v648_v57 = vpop.xlane.xlu0 %647 }
 0x324   : > { %v652_v58 = vadd.f32 %v648_v57, %v636_v54  ;;  %v727_v59 = vpop.f32.mrf.mxu1 }
 0x325   : > { %v730_v62 = vadd.f32 %v727_v59, %v703_v56  ;;  %v806_v55 = vld [vmem:[#allocation6 + $0x8] sm:$0xff] }
 0x326   : > { %657 = vst.msk [vmem:[#allocation6 + $0x18] sm:$0xff] %vm394_vm2, %v652_v58 }
 0x327   : > { %731 = vst.msk [vmem:[#allocation7 + $0x8] sm:$0xff] %vm403_vm1, %v730_v62 }
 0x32d   : > { %v808_v61 = vld [vmem:[#allocation6 + $0x18] sm:$0xff] }
 0x32e   : > { %1133 = vrcp.f32 %v808_v61  ;;  %v823_v30 = vld [vmem:[#allocation7 + $0x8] sm:$0xff] }
 0x32f   : > { %1135 = vrcp.f32 %v806_v55 }
 0x332   : > { %v797_v12 = vpop.f32.mrf.mxu3 }
 0x333   : > { %v639_v2 = vpop.xlane.xlu2 %638  ;;  %v391_v3 = vpop.permute.xlu1 %390 }
 0x334   : > { %v1134_v4 = vpop.eup %1133  ;;  %v649_v5 = vadd.f32 %v639_v2, %v633_v1  ;;  %393 = vst.msk [vmem:[#allocation3] sm:$0xff] %vm345_vm0, %v391_v3 }
 0x335   : > { %861 = vperm.xlu2 %1107, %v1134_v4   ;;  %v1136_v13 = vpop.eup %1135 }
 0x336   : > { %654 = vst.msk [vmem:[#allocation6] sm:$0xff] %vm394_vm2, %v649_v5 }
 0x33b   : > { %v736_v6 = vpop.permute.xlu2 %735  ;;  %v771_v7 = vpop.permute.xlu1 %770  ;;  %v813_v8 = vld [vmem:[#allocation3] sm:$0xff] }
 0x33c   : > { %v738_v9 = vmul.f32 %v736_v6, %v732_v49  ;;  %v773_v10 = vmul.f32 %v771_v7, %v767_v53  ;;  %848 = vrot.lane.b32.xlu1 %v813_v8, %s1253_s14  ;;  %831 = vrot.lane.b32.xlu0 %v813_v8, %s1254_s1  ;;  %v692_v22 = vpop.f32.mrf.mxu0  ;;  %s319_s14 = scalar_lea.vmem [#allocation11], %s1612_s13  ;;  %s1265_s1 = smov 24  }
 0x33d   : > { %665 = vperm.xlu2 %1107, %v1132_v63   ;;  %v805_v14 = vld [vmem:[#allocation6] sm:$0xff]  ;;  %s888_s19 = sshll.u32 %s319_s14, 4  ;;  %s889_s19 = int_to_ptr.vmem [resolvable:$true] %s888_s19 }
 0x33e   : > { %v765_v15 = vadd.f32 %v762_v11, %v738_v9  ;;  %v800_v16 = vadd.f32 %v797_v12, %v773_v10  ;;  %1137 = vrcp.f32 %v805_v14 }
 0x340   : > { %766 = vst.msk [vmem:[#allocation7 + $0x10] sm:$0xff] %vm403_vm1, %v765_v15 }
 0x341   : > { %801 = vst.msk [vmem:[#allocation7 + $0x18] sm:$0xff] %vm403_vm1, %v800_v16 }
 0x344   : > { %v1138_v17 = vpop.eup %1137  ;;  %826 = vperm.xlu0 %1109, %v1136_v13  }
 0x345   : > { %817 = vperm.xlu1 %1108, %v1138_v17  }
 0x347   : > { %v841_v25 = vld [vmem:[#allocation7 + $0x10] sm:$0xff] }
 0x348   : > { %v858_v38 = vld [vmem:[#allocation7 + $0x18] sm:$0xff] }
 0x34c   : > { %865 = vrot.lane.b32.xlu0 %v813_v8, %s1255_s15  ;;  %s1028_s15 = sshll.u32 %s1243_s24, 3 }
 0x34d   : > { %s886_s18 = scalar_lea.hbm %s1604_s6, %s1028_s15 }
 0x34e   : > { %s890_s7 = sshll.u32 %s886_s18, 4  ;;  %s891_s7 = int_to_ptr.hbm [resolvable:$true] %s890_s7 }
 0x34f   : > { %s1183_s24 = sshra.s32 %s891_s7, 4  ;;  %s1184_s24 = int_to_ptr.hbm [resolvable:$true] %s1183_s24 }
 0x350   : > { %s1185_s27 = scalar_lea.hbm %s1184_s24, 8  ;;  %p1190_p8 = scmp.lt.s32.totalorder %s1184_s24, %s1604_s6 }
 0x351   : > { %p1186_p5 = scmp.ne.s32.totalorder %s1184_s24, %s1185_s27 }
 0x353   : > { %p1187_p6 = pnand %p1186_p5, %p1352_p9 }
 0x355   : > { %p1188_p7 = pneg %p1187_p6 }
 0x381   : > { %v845_v24 = vpop.permute.xlu1 %844 }
 0x382   : > { %v847_v26 = vmul.f32 %v845_v24, %v841_v25 }
 0x38f   : > { %v862_v18 = vpop.permute.xlu2 %861 }
 0x390   : > { %v864_v39 = vmul.f32 %v862_v18, %v858_v38 }
 0x397   : > { %v666_v20 = vpop.permute.xlu2 %665 }
 0x398   : > { %v668_v21 = vmul.f32 %v666_v20, %v662_v19 }
 0x39a   : > { %v695_v23 = vadd.f32 %v692_v22, %v668_v21 }
 0x39c   : > { %696 = vst.msk [vmem:[#allocation7] sm:$0xff] %vm403_vm1, %v695_v23 }
 0x3a3   : > { %v814_v34 = vld [vmem:[#allocation7] sm:$0xff] }
 0x3ae   : > { %v849_v27 = vpop.permute.xlu1 %848  ;;  %v832_v28 = vpop.permute.xlu0 %831 }
 0x3af   : > { %v851_v29 = vmul.f32 %v849_v27, %v847_v26 }
 0x3b1   : > { %853 = vrot.lane.b32.xlu2 %v851_v29, %s1263_s28 }
 0x3b6   : > { %v827_v31 = vpop.permute.xlu0 %826 }
 0x3b7   : > { %v829_v32 = vmul.f32 %v827_v31, %v823_v30  ;;  %v818_v33 = vpop.permute.xlu1 %817 }
 0x3b8   : > { %v820_v35 = vmul.f32 %v818_v33, %v814_v34 }
 0x3b9   : > { %v834_v36 = vmul.f32 %v832_v28, %v829_v32 }
 0x3ba   : > { %v821_v37 = vmul.f32 %v820_v35, %v813_v8 }
 0x3bb   : > { %836 = vrot.lane.b32.xlu0 %v834_v36, %s1264_s8  ;;  %s1189_s8 = scalar_lea.hbm %s1604_s6, 16 }
 0x3bc   : > { %822 = vst.msk [vmem:[%s319_s14] sm:$0xff] %vm403_vm1, %v821_v37  ;;  %p1191_p10 = scmp.lt.s32.totalorder %s1189_s8, %s1185_s27 }
 0x3be   : > { %v866_v40 = vpop.permute.xlu0 %865  ;;  %p1192_p13 = por %p1191_p10, %p1190_p8 }
 0x3bf   : > { %v868_v41 = vmul.f32 %v866_v40, %v864_v39 }
 0x3c0   : > { %p1193_p0 = pnand %p1192_p13, %p1188_p7 }
 0x3c1   : > { %870 = vrot.lane.b32.xlu1 %v868_v41, %s1265_s1 }
 0x40b   : > { %v854_v43 = vpop.permute.xlu2 %853 }
 0x42d   : > { %v837_v42 = vpop.permute.xlu0 %836 }
 0x42e   : > { %840 = vst.msk [vmem:[%s319_s14] sm:$0xff] %vm839_vm7, %v837_v42 }
 0x42f   : > { %857 = vst.msk [vmem:[%s319_s14] sm:$0xff] %vm856_vm8, %v854_v43 }
 0x433   : > { %v871_v45 = vpop.permute.xlu1 %870 }
 0x434   : > { %874 = vst.msk [vmem:[%s319_s14] sm:$0xff] %vm873_vm9, %v871_v45 }
 0x435   : > { %1196 = shalt.err (!%p1193_p0)
}
 0x436   : > { %1034 = dma.vmem_to_hbm [thread:$0]  (%p1352_p9), %s889_s19, 128, %s891_s7, %s876_s20  }
 0x437 PF: > { %s902_s30 = sand.u32 1, %s1231_s21   ;;  %p1041_p1 = pnand %p1003_p12, %p1359_p11 }
 0x438   : > { %s903_s14 = scalar_lea.sflag [#allocation10], %s902_s30 }
 0x439   : > { %p1042_p2 = pneg %p1041_p1 }
 0x43b   : > { %1226 = dma.done.wait (%p1042_p2), %s903_s14, 128  }
 0x43c   : > { %1228 = vsyncadd (%p1042_p2), %s903_s14, 4294967168  ;;  %s22_s26 = sadd.s32 1, %s1251_s26   ;;  %s1613_s21 = smov %s1235_s22 }
 0x43d   : > { %p19_p3 = scmp.ge.s32.totalorder %s22_s26, 4   ;;  %s1614_s22 = smov %s1239_s23 }
 0x43e   : > { %s1615_s23 = smov %s1357_s11  ;;  %s1616_s24 = smov %s1247_s25 }
 0x43f   : > { %s1617_s25 = smov %s1619_s29  ;;  %21 = sbr.rel (!%p19_p3) target bundleno = 8 (0x8), region = 103 }
 0x444   :  { %909 = vsyncpa [#allocation9], 1 }
 0x445   :  { %911 = vsyncpa [#allocation9 + $0x1], 1 }
 0x446   :  { %912 = vsyncpa [#allocation10], 1 }
 0x447   :  { %914 = vsyncpa [#allocation10 + $0x1], 1 }

</bundles_post_ra>
